<compile_context>
chip_gen: v7x
topology: tpu7x:2x2x1
jax: 0.10.0
libtpu: 0.0.40
codegen_flags: <defaults>
</compile_context>

<pallas_src>
import math
import functools

import numpy as np
import jax
import jax.numpy as jnp
from jax import lax
from jax.experimental import pallas as pl
from jax.experimental.pallas import tpu as pltpu

N_EMBD = 64
BLOCK_SIZE = 32   # module's max context; kernel handles the actual T <= 32
NUM_HEADS = 4
HEAD_SIZE = 16
DROPOUT = 0.0     # p=0.0 -> identity (no-op)


# --------------------------------------------------------------------------
# Kernel
# --------------------------------------------------------------------------
def _mha_kernel(x_ref, wqkv_ref, wpT_ref, bp_ref, mask_ref, o_ref, *,
                num_heads, head_size, compute_dtype, exact_recip):
    # x_ref / o_ref : (M, C)  with M = Bblk * T rows of this batch block
    # wqkv_ref      : (C, 3*H*hs)   (scale already folded into Q columns)
    # wpT_ref       : (H*hs, C)
    # bp_ref        : (1, C)
    # mask_ref      : (H*M, H*M) additive (0 / -1e30) causal + block mask
    M, C = x_ref.shape
    H, hs = num_heads, head_size
    HH = H * hs
    R = H * M

    # ---- fused QKV projection: one (M, C) @ (C, 3*H*hs) MXU matmul --------
    x2d = x_ref[...].astype(compute_dtype)
    qkv = jnp.dot(x2d, wqkv_ref[...],
                  preferred_element_type=jnp.float32)            # (M, 3*HH) f32

    # ---- head-stack relayout: (M, H*hs) -> (H*M, hs), rows ordered (h, m) --
    def stack_heads(a2d):
        return jnp.concatenate(
            [a2d[:, h * hs:(h + 1) * hs] for h in range(H)], axis=0)

    qs = stack_heads(qkv[:, :HH]).astype(compute_dtype)          # (R, hs)
    ks = stack_heads(qkv[:, HH:2 * HH]).astype(compute_dtype)    # (R, hs)
    vs = stack_heads(qkv[:, 2 * HH:]).astype(compute_dtype)      # (R, hs)

    # ---- single block-diagonal attention ----------------------------------
    # S = Qs @ Ks^T : one R x hs x R MXU matmul; the precomputed additive
    # mask kills non-causal and cross-(batch,head)-block entries (exp -> 0).
    s = lax.dot_general(qs, ks, (((1,), (1,)), ((), ())),
                        preferred_element_type=jnp.float32)      # (R, R) f32
    s = s + mask_ref[...]
    s = s - jnp.max(s, axis=-1, keepdims=True)
    p = jnp.exp(s)
    inv_denom = pl.reciprocal(jnp.sum(p, axis=-1, keepdims=True),
                              approx=not exact_recip)            # (R, 1)

    pv = jnp.dot(p.astype(compute_dtype), vs,
                 preferred_element_type=jnp.float32)             # (R, hs) f32
    pv = pv * inv_denom                                          # fold denom into PV

    # ---- relayout back to (M, H*hs): aligned sublane slices + lane concat --
    o_cat = jnp.concatenate([pv[h * M:(h + 1) * M, :] for h in range(H)],
                            axis=1)                               # (M, HH) f32

    # ---- single output projection + bias -----------------------------------
    y = jnp.dot(o_cat.astype(compute_dtype), wpT_ref[...],
                preferred_element_type=jnp.float32) + bp_ref[...]
    # NOTE: C=64 < 128 lanes -> masked stores; a lane-dense (M*C/128, 128)
    # output view only becomes worthwhile once M grows well beyond this size.
    o_ref[...] = y.astype(o_ref.dtype)


# --------------------------------------------------------------------------
# One-time (init) preparation — hoisted out of the per-call path
# --------------------------------------------------------------------------
def pack_mha_params(wq, wk, wv, wp, bp, *, compute_dtype=jnp.float32):
    """Pack per-head weights once: fused QKV weight (scale folded into Q),
    transposed projection weight, reshaped bias."""
    H, C, hs = wq.shape
    scale = 1.0 / math.sqrt(C)     # module divides by sqrt(n_embd), not sqrt(head_size)

    def cat_heads(w):              # (H, C, hs) -> (C, H*hs)
        return jnp.transpose(w, (1, 0, 2)).reshape(C, H * hs)

    wqkv = jnp.concatenate([cat_heads(wq) * scale,     # fold scale into Q columns
                            cat_heads(wk),
                            cat_heads(wv)], axis=1).astype(compute_dtype)  # (C, 3*H*hs)
    wpT = wp.T.astype(compute_dtype)                   # (H*hs, C)
    bp2 = bp.reshape(1, C).astype(jnp.float32)         # (1, C)
    return wqkv, wpT, bp2


def build_attention_mask(num_heads, batch_block, seq_len):
    """Additive (0 / -1e30) mask combining causality with the (batch, head)
    block-diagonal structure of the head-stacked S matrix. Built once (numpy)."""
    M = batch_block * seq_len
    R = num_heads * M
    idx = np.arange(R)
    h = idx // M
    b = (idx % M) // seq_len
    t = idx % seq_len
    allow = ((h[:, None] == h[None, :]) &
             (b[:, None] == b[None, :]) &
             (t[:, None] >= t[None, :]))
    return jnp.asarray(np.where(allow, 0.0, -1e30), dtype=jnp.float32)


def choose_batch_block(batch, seq_len, target_rows=128):
    """Largest divisor of `batch` such that bblk*T <= target_rows per grid step
    (keeps the block-diagonal S matrix small while filling the MXU M dim)."""
    best = 1
    for d in range(1, batch + 1):
        if batch % d == 0 and d * seq_len <= target_rows:
            best = d
    return best


# --------------------------------------------------------------------------
# Forward wrapper
# --------------------------------------------------------------------------
def multi_head_attention(x, wqkv, wpT, bp2, attn_mask, *,
                         num_heads, head_size, batch_block,
                         compute_dtype=jnp.float32):
    """x: (B, T, C). Weights/mask must come from pack_mha_params /
    build_attention_mask (one-time init)."""
    B, T, C = x.shape
    H, hs = num_heads, head_size
    HH = H * hs
    m_blk = batch_block * T
    R = H * m_blk
    assert B % batch_block == 0
    assert attn_mask.shape == (R, R)

    # Fold (B, T) into one row axis so the projections see M = Bblk*T rows.
    x2d = x.reshape(B * T, C)

    exact = (np.dtype(compute_dtype) == np.dtype(jnp.float32))
    kernel = functools.partial(_mha_kernel, num_heads=H, head_size=hs,
                               compute_dtype=compute_dtype, exact_recip=exact)

    y2d = pl.pallas_call(
        kernel,
        out_shape=jax.ShapeDtypeStruct((B * T, C), x.dtype),
        grid=(B // batch_block,),
        in_specs=[
            pl.BlockSpec((m_blk, C), lambda g: (g, 0)),        # x rows of this block
            pl.BlockSpec((C, 3 * HH), lambda g: (0, 0)),       # fused QKV weight
            pl.BlockSpec((HH, C), lambda g: (0, 0)),           # proj weight^T
            pl.BlockSpec((1, C), lambda g: (0, 0)),            # proj bias
            pl.BlockSpec((R, R), lambda g: (0, 0)),            # additive mask
        ],
        out_specs=pl.BlockSpec((m_blk, C), lambda g: (g, 0)),
        compiler_params=pltpu.CompilerParams(
            dimension_semantics=("arbitrary",)),
    )(x2d, wqkv, wpT, bp2, attn_mask)

    return y2d.reshape(B, T, C)


# --------------------------------------------------------------------------
# Pure-JAX reference mirroring the PyTorch forward
# --------------------------------------------------------------------------
def ref_forward(x, wq, wk, wv, wp, bp):
    B, T, C = x.shape
    mask = jnp.tril(jnp.ones((T, T)))
    outs = []
    for h in range(wq.shape[0]):
        q = x @ wq[h]
        k = x @ wk[h]
        v = x @ wv[h]
        s = (q @ jnp.swapaxes(k, -1, -2)) / math.sqrt(C)
        s = jnp.where(mask == 0, -jnp.inf, s)
        p = jax.nn.softmax(s, axis=-1)
        outs.append(p @ v)
    cat = jnp.concatenate(outs, axis=-1)
    return cat @ wp.T + bp


if __name__ == "__main__":
    B, T, C = 2, 8, N_EMBD
    H, hs = NUM_HEADS, HEAD_SIZE

    key = jax.random.PRNGKey(0)
    kx, kq, kk, kv, kw, kb = jax.random.split(key, 6)

    x = jax.random.normal(kx, (B, T, C), dtype=jnp.float32)
    # Per-head Linear(n_embd, head_size, bias=False) weights, stored as (H, C, hs)
    wq = jax.random.normal(kq, (H, C, hs), dtype=jnp.float32) * 0.1
    wk = jax.random.normal(kk, (H, C, hs), dtype=jnp.float32) * 0.1
    wv = jax.random.normal(kv, (H, C, hs), dtype=jnp.float32) * 0.1
    # proj = Linear(num_heads*head_size, n_embd): weight (out=C, in=H*hs), bias (C,)
    wp = jax.random.normal(kw, (C, H * hs), dtype=jnp.float32) * 0.1
    bp = jax.random.normal(kb, (C,), dtype=jnp.float32) * 0.1

    ref = ref_forward(x, wq, wk, wv, wp, bp)

    # ---- one-time init (hoisted out of the call path) ----------------------
    bblk = choose_batch_block(B, T)                 # B=2, T=8 -> bblk=2, grid=(1,)
    attn_mask = build_attention_mask(H, bblk, T)

    # f32 compute path (exact reciprocal): close to the PyTorch module's numerics
    params_f32 = pack_mha_params(wq, wk, wv, wp, bp, compute_dtype=jnp.float32)
    out_f32 = jax.block_until_ready(
        multi_head_attention(x, *params_f32, attn_mask,
                             num_heads=H, head_size=hs, batch_block=bblk,
                             compute_dtype=jnp.float32))
    assert out_f32.shape == (B, T, C)
    assert jnp.allclose(out_f32, ref, rtol=1e-2, atol=1e-2), "f32 mismatch vs reference"

    # bf16-in / f32-accumulate path (v6e/v7x MXU); loose sanity tolerance
    params_bf16 = pack_mha_params(wq, wk, wv, wp, bp, compute_dtype=jnp.bfloat16)
    out_bf16 = jax.block_until_ready(
        multi_head_attention(x, *params_bf16, attn_mask,
                             num_heads=H, head_size=hs, batch_block=bblk,
                             compute_dtype=jnp.bfloat16))
    assert jnp.allclose(out_bf16, ref, rtol=1e-1, atol=1e-1), "bf16 mismatch vs reference"

    print("KERNEL_OK")
</pallas_src>

<mosaic_0001>
module attributes {stable_mosaic.version = 11 : i64} {
  func.func @_mha_kernel(%arg0: i32, %arg1: memref<16x64xf32, #tpu.memory_space<vmem>>, %arg2: memref<64x192xf32, #tpu.memory_space<vmem>>, %arg3: memref<64x64xf32, #tpu.memory_space<vmem>>, %arg4: memref<1x64xf32, #tpu.memory_space<vmem>>, %arg5: memref<64x64xf32, #tpu.memory_space<vmem>>, %arg6: memref<16x64xf32, #tpu.memory_space<vmem>>) attributes {dimension_semantics = [#tpu.dimension_semantics<arbitrary>], iteration_bounds = array<i64: 1>, scalar_prefetch = 0 : i64, scratch_operands = 0 : i64, tpu.core_type = #tpu.core_type<tc>, window_params = [{transform_indices = @transform_0, window_bounds = array<i64: 16, 64>}, {pipeline_mode = #tpu.pipeline_mode<synchronous>, transform_indices = @transform_1, window_bounds = array<i64: 64, 192>}, {pipeline_mode = #tpu.pipeline_mode<synchronous>, transform_indices = @transform_2, window_bounds = array<i64: 64, 64>}, {pipeline_mode = #tpu.pipeline_mode<synchronous>, transform_indices = @transform_3, window_bounds = array<i64: 1, 64>}, {pipeline_mode = #tpu.pipeline_mode<synchronous>, transform_indices = @transform_4, window_bounds = array<i64: 64, 64>}, {transform_indices = @transform_5, window_bounds = array<i64: 16, 64>}]} {
    %c0 = arith.constant 0 : index
    %c0_0 = arith.constant 0 : index
    %0 = vector.load %arg1[%c0, %c0_0] : memref<16x64xf32, #tpu.memory_space<vmem>>, vector<16x64xf32>
    %c0_1 = arith.constant 0 : index
    %c0_2 = arith.constant 0 : index
    %1 = vector.load %arg2[%c0_1, %c0_2] : memref<64x192xf32, #tpu.memory_space<vmem>>, vector<64x192xf32>
    %cst = arith.constant dense<0.000000e+00> : vector<16x192xf32>
    %2 = tpu.matmul %0, %1, %cst {dimension_numbers = #tpu.dot_dimension_numbers<[1], [0], [0], [1], [0, 0, 1, 1], [], []>} : vector<16x64xf32>, vector<64x192xf32>, vector<16x192xf32> -> vector<16x192xf32>
    %3 = vector.extract_strided_slice %2 {offsets = [0, 0], sizes = [16, 64], strides = [1, 1]} : vector<16x192xf32> to vector<16x64xf32>
    %4 = vector.extract_strided_slice %3 {offsets = [0, 0], sizes = [16, 16], strides = [1, 1]} : vector<16x64xf32> to vector<16x16xf32>
    %5 = vector.extract_strided_slice %3 {offsets = [0, 16], sizes = [16, 16], strides = [1, 1]} : vector<16x64xf32> to vector<16x16xf32>
    %6 = vector.extract_strided_slice %3 {offsets = [0, 32], sizes = [16, 16], strides = [1, 1]} : vector<16x64xf32> to vector<16x16xf32>
    %7 = vector.extract_strided_slice %3 {offsets = [0, 48], sizes = [16, 16], strides = [1, 1]} : vector<16x64xf32> to vector<16x16xf32>
    %8 = tpu.concatenate %4, %5, %6, %7 in 0 : vector<16x16xf32>, vector<16x16xf32>, vector<16x16xf32>, vector<16x16xf32> -> vector<64x16xf32>
    %9 = vector.extract_strided_slice %2 {offsets = [0, 64], sizes = [16, 64], strides = [1, 1]} : vector<16x192xf32> to vector<16x64xf32>
    %10 = vector.extract_strided_slice %9 {offsets = [0, 0], sizes = [16, 16], strides = [1, 1]} : vector<16x64xf32> to vector<16x16xf32>
    %11 = vector.extract_strided_slice %9 {offsets = [0, 16], sizes = [16, 16], strides = [1, 1]} : vector<16x64xf32> to vector<16x16xf32>
    %12 = vector.extract_strided_slice %9 {offsets = [0, 32], sizes = [16, 16], strides = [1, 1]} : vector<16x64xf32> to vector<16x16xf32>
    %13 = vector.extract_strided_slice %9 {offsets = [0, 48], sizes = [16, 16], strides = [1, 1]} : vector<16x64xf32> to vector<16x16xf32>
    %14 = tpu.concatenate %10, %11, %12, %13 in 0 : vector<16x16xf32>, vector<16x16xf32>, vector<16x16xf32>, vector<16x16xf32> -> vector<64x16xf32>
    %15 = vector.extract_strided_slice %2 {offsets = [0, 128], sizes = [16, 64], strides = [1, 1]} : vector<16x192xf32> to vector<16x64xf32>
    %16 = vector.extract_strided_slice %15 {offsets = [0, 0], sizes = [16, 16], strides = [1, 1]} : vector<16x64xf32> to vector<16x16xf32>
    %17 = vector.extract_strided_slice %15 {offsets = [0, 16], sizes = [16, 16], strides = [1, 1]} : vector<16x64xf32> to vector<16x16xf32>
    %18 = vector.extract_strided_slice %15 {offsets = [0, 32], sizes = [16, 16], strides = [1, 1]} : vector<16x64xf32> to vector<16x16xf32>
    %19 = vector.extract_strided_slice %15 {offsets = [0, 48], sizes = [16, 16], strides = [1, 1]} : vector<16x64xf32> to vector<16x16xf32>
    %20 = tpu.concatenate %16, %17, %18, %19 in 0 : vector<16x16xf32>, vector<16x16xf32>, vector<16x16xf32>, vector<16x16xf32> -> vector<64x16xf32>
    %cst_3 = arith.constant dense<0.000000e+00> : vector<64x64xf32>
    %21 = tpu.matmul %8, %14, %cst_3 {dimension_numbers = #tpu.dot_dimension_numbers<[1], [1], [0], [0], [0, 0, 1, 0], [], []>} : vector<64x16xf32>, vector<64x16xf32>, vector<64x64xf32> -> vector<64x64xf32>
    %c0_4 = arith.constant 0 : index
    %c0_5 = arith.constant 0 : index
    %22 = vector.load %arg5[%c0_4, %c0_5] : memref<64x64xf32, #tpu.memory_space<vmem>>, vector<64x64xf32>
    %23 = arith.addf %21, %22 : vector<64x64xf32>
    %cst_6 = arith.constant dense<0xFF800000> : vector<64xf32>
    %24 = vector.multi_reduction <maximumf>, %23, %cst_6 [1] : vector<64x64xf32> to vector<64xf32>
    %25 = vector.shape_cast %24 : vector<64xf32> to vector<64x1xf32>
    %26 = vector.broadcast %25 : vector<64x1xf32> to vector<64x64xf32>
    %27 = arith.subf %23, %26 : vector<64x64xf32>
    %28 = math.exp %27 : vector<64x64xf32>
    %cst_7 = arith.constant dense<0.000000e+00> : vector<64xf32>
    %29 = vector.multi_reduction <add>, %28, %cst_7 [1] : vector<64x64xf32> to vector<64xf32>
    %30 = vector.shape_cast %29 : vector<64xf32> to vector<64x1xf32>
    %31 = tpu.reciprocal %30 : vector<64x1xf32> -> vector<64x1xf32>
    %cst_8 = arith.constant dense<0.000000e+00> : vector<64x16xf32>
    %32 = tpu.matmul %28, %20, %cst_8 {dimension_numbers = #tpu.dot_dimension_numbers<[1], [0], [0], [1], [0, 0, 1, 1], [], []>} : vector<64x64xf32>, vector<64x16xf32>, vector<64x16xf32> -> vector<64x16xf32>
    %33 = vector.broadcast %31 : vector<64x1xf32> to vector<64x16xf32>
    %34 = arith.mulf %32, %33 : vector<64x16xf32>
    %35 = vector.extract_strided_slice %34 {offsets = [0, 0], sizes = [16, 16], strides = [1, 1]} : vector<64x16xf32> to vector<16x16xf32>
    %36 = vector.extract_strided_slice %34 {offsets = [16, 0], sizes = [16, 16], strides = [1, 1]} : vector<64x16xf32> to vector<16x16xf32>
    %37 = vector.extract_strided_slice %34 {offsets = [32, 0], sizes = [16, 16], strides = [1, 1]} : vector<64x16xf32> to vector<16x16xf32>
    %38 = vector.extract_strided_slice %34 {offsets = [48, 0], sizes = [16, 16], strides = [1, 1]} : vector<64x16xf32> to vector<16x16xf32>
    %39 = tpu.concatenate %35, %36, %37, %38 in 1 : vector<16x16xf32>, vector<16x16xf32>, vector<16x16xf32>, vector<16x16xf32> -> vector<16x64xf32>
    %c0_9 = arith.constant 0 : index
    %c0_10 = arith.constant 0 : index
    %40 = vector.load %arg3[%c0_9, %c0_10] : memref<64x64xf32, #tpu.memory_space<vmem>>, vector<64x64xf32>
    %cst_11 = arith.constant dense<0.000000e+00> : vector<16x64xf32>
    %41 = tpu.matmul %39, %40, %cst_11 {dimension_numbers = #tpu.dot_dimension_numbers<[1], [0], [0], [1], [0, 0, 1, 1], [], []>} : vector<16x64xf32>, vector<64x64xf32>, vector<16x64xf32> -> vector<16x64xf32>
    %c0_12 = arith.constant 0 : index
    %c0_13 = arith.constant 0 : index
    %42 = vector.load %arg4[%c0_12, %c0_13] : memref<1x64xf32, #tpu.memory_space<vmem>>, vector<1x64xf32>
    %43 = vector.broadcast %42 : vector<1x64xf32> to vector<16x64xf32>
    %44 = arith.addf %41, %43 : vector<16x64xf32>
    %c0_14 = arith.constant 0 : index
    %c0_15 = arith.constant 0 : index
    %45 = vector.load %arg6[%c0_14, %c0_15] : memref<16x64xf32, #tpu.memory_space<vmem>>, vector<16x64xf32>
    tpu.vector_store %arg6[%c0_14, %c0_15], %44 {strides = array<i32>} : memref<16x64xf32, #tpu.memory_space<vmem>>, vector<16x64xf32>,
    return
  }
  func.func @transform_0(%arg0: i32) -> (i32, i32) {
    %c0_i32 = arith.constant 0 : i32
    %c0_i32_0 = arith.constant 0 : i32
    return %arg0, %c0_i32 : i32, i32
  }
  func.func @transform_1(%arg0: i32) -> (i32, i32) {
    %c0_i32 = arith.constant 0 : i32
    %c0_i32_0 = arith.constant 0 : i32
    %c0_i32_1 = arith.constant 0 : i32
    return %c0_i32, %c0_i32_0 : i32, i32
  }
  func.func @transform_2(%arg0: i32) -> (i32, i32) {
    %c0_i32 = arith.constant 0 : i32
    %c0_i32_0 = arith.constant 0 : i32
    %c0_i32_1 = arith.constant 0 : i32
    return %c0_i32, %c0_i32_0 : i32, i32
  }
  func.func @transform_3(%arg0: i32) -> (i32, i32) {
    %c0_i32 = arith.constant 0 : i32
    %c0_i32_0 = arith.constant 0 : i32
    %c0_i32_1 = arith.constant 0 : i32
    return %c0_i32, %c0_i32_0 : i32, i32
  }
  func.func @transform_4(%arg0: i32) -> (i32, i32) {
    %c0_i32 = arith.constant 0 : i32
    %c0_i32_0 = arith.constant 0 : i32
    %c0_i32_1 = arith.constant 0 : i32
    return %c0_i32, %c0_i32_0 : i32, i32
  }
  func.func @transform_5(%arg0: i32) -> (i32, i32) {
    %c0_i32 = arith.constant 0 : i32
    %c0_i32_0 = arith.constant 0 : i32
    return %arg0, %c0_i32 : i32, i32
  }
}

</mosaic_0001>

<bundles_post_ra>
// kernel: tpu_custom_call.1
= control target key start
LH: loop header
LB: loop body
LE: loop exit
PB: predicated region body
PF: predicated region fallthrough
CT: control target
= control target key end

     0   :  { %10 = vsyncpa [#allocation3], 0  ;;  %s1370_s0 = inlined_call_operand.hbm [shape: f32[16,64], index: 0, kind: input, shape index: {}]   ;;  %s1371_s1 = inlined_call_operand.hbm [shape: f32[64,192], index: 1, kind: input, shape index: {}]   ;;  %s1372_s2 = inlined_call_operand.hbm [shape: f32[64,64], index: 2, kind: input, shape index: {}]   ;;  %s1373_s3 = inlined_call_operand.vmem [shape: f32[1,64], index: 3, kind: input, shape index: {}]   ;;  %s1374_s4 = inlined_call_operand.hbm [shape: f32[64,64], index: 4, kind: input, shape index: {}]   ;;  %s1375_s5 = inlined_call_operand.hbm [shape: f32[16,64], index: 5, kind: output, shape index: {}]  }
   0x1   :  { %11 = vsyncpa [#allocation6], 0 }
   0x2   :  { %12 = vsyncpa [#allocation9], 0 }
   0x3   :  { %13 = vsyncpa [#allocation4], 0  ;;  %s1159_s18 = smov [#allocation5]   ;;  %s1041_s22 = scalar_lea.hbm %s1371_s1, 2048 }
   0x4   :  { %s31_s19 = sshll.u32 %s1159_s18, 4  ;;  %p1042_p0 = scmp.ne.s32.totalorder %s1371_s1, %s1041_s22  ;;  %s32_s19 = int_to_ptr.vmem [resolvable:$true] %s31_s19 }
   0x5   :  { %p1045_p1 = scmp.lt.u32.totalorder %s1041_s22, %s1371_s1 }
   0x7   :  { %p1047_p2 = pnand %p1045_p1, %p1042_p0 }
   0x9   :  { %1050 = shalt.err (!%p1047_p2)
}
   0xa   :  { %s1051_s27 = scalar_lea.vmem %s32_s19, 2048  ;;  %p1056_p4 = scmp.lt.s32.totalorder %s32_s19, %s32_s19 }
   0xb   :  { %p1052_p3 = scmp.ne.s32.totalorder %s32_s19, %s1051_s27  ;;  %p1057_p5 = scmp.lt.s32.totalorder %s1051_s27, %s1051_s27 }
   0xd   :  { %p1058_p6 = por %p1057_p5, %p1056_p4 }
   0xf   :  { %p1059_p7 = pnand %p1058_p6, %p1052_p3 }
  0x11   :  { %1062 = shalt.err (!%p1059_p7)
}
  0x12   :  { %s1160_s28 = smov 256   ;;  %s1161_s29 = smov 16  }
  0x13   :  { %37 = dma.hbm_to_vmem [thread:$0]  %s1371_s1, 2048, %s32_s19, [#allocation6], %s1160_s28, %s1160_s28, %s1161_s29  }
  0x14   :  { %s1162_s7 = smov [#allocation2]   ;;  %s1063_s11 = scalar_lea.hbm %s1370_s0, 256 }
  0x15   :  { %s19_s8 = sshll.u32 %s1162_s7, 4  ;;  %p1064_p8 = scmp.ne.s32.totalorder %s1370_s0, %s1063_s11  ;;  %s20_s8 = int_to_ptr.vmem [resolvable:$true] %s19_s8 }
  0x16   :  { %p1067_p9 = scmp.lt.u32.totalorder %s1063_s11, %s1370_s0 }
  0x18   :  { %p1069_p10 = pnand %p1067_p9, %p1064_p8 }
  0x1a   :  { %1072 = shalt.err (!%p1069_p10)
}
  0x1b   :  { %s1073_s16 = scalar_lea.vmem %s20_s8, 256  ;;  %p1078_p12 = scmp.lt.s32.totalorder %s20_s8, %s20_s8 }
  0x1c   :  { %p1074_p11 = scmp.ne.s32.totalorder %s20_s8, %s1073_s16  ;;  %p1079_p13 = scmp.lt.s32.totalorder %s1073_s16, %s1073_s16 }
  0x1e   :  { %p1080_p0 = por %p1079_p13, %p1078_p12 }
  0x20   :  { %p1081_p1 = pnand %p1080_p0, %p1074_p11 }
  0x22   :  { %1084 = shalt.err (!%p1081_p1)
}
  0x23   :  { %s1163_s1 = smov 128   ;;  %s1164_s17 = smov 8  }
  0x24   :  { %25 = dma.hbm_to_vmem [thread:$0]  %s1370_s0, 256, %s20_s8, [#allocation3], %s1163_s1, %s1163_s1, %s1164_s17  }
  0x25   :  { %s1165_s20 = smov [#allocation7]   ;;  %s1166_s22 = smov [#allocation8]  }
  0x26   :  { %s43_s21 = sshll.u32 %s1165_s20, 4  ;;  %s57_s23 = sshll.u32 %s1166_s22, 4  ;;  %s44_s21 = int_to_ptr.vmem [resolvable:$true] %s43_s21  ;;  %s1233_s23 = int_to_ptr.vmem [resolvable:$true] %s57_s23 }
  0x27   :  { %s1085_s26 = scalar_lea.hbm %s1372_s2, 1024 }
  0x28   :  { %p1086_p2 = scmp.ne.s32.totalorder %s1372_s2, %s1085_s26  ;;  %p1089_p3 = scmp.lt.u32.totalorder %s1085_s26, %s1372_s2 }
  0x2a   :  { %p1091_p4 = pnand %p1089_p3, %p1086_p2 }
  0x2c   :  { %1094 = shalt.err (!%p1091_p4)
}
  0x2d   :  { %s1095_s0 = scalar_lea.vmem %s44_s21, 1024  ;;  %p1100_p6 = scmp.lt.s32.totalorder %s44_s21, %s44_s21 }
  0x2e   :  { %p1096_p5 = scmp.ne.s32.totalorder %s44_s21, %s1095_s0  ;;  %p1101_p7 = scmp.lt.s32.totalorder %s1095_s0, %s1095_s0 }
  0x30   :  { %p1102_p8 = por %p1101_p7, %p1100_p6 }
  0x32   :  { %p1103_p9 = pnand %p1102_p8, %p1096_p5 }
  0x34   :  { %1106 = shalt.err (!%p1103_p9)
}
  0x35   :  { %49 = dma.hbm_to_vmem [thread:$0]  %s1372_s2, 1024, %s44_s21, [#allocation6], %s1163_s1, %s1163_s1, %s1164_s17  }
  0x36   :  { %s1107_s11 = scalar_lea.hbm %s1374_s4, 1024 }
  0x37   :  { %p1108_p10 = scmp.ne.s32.totalorder %s1374_s4, %s1107_s11  ;;  %p1111_p11 = scmp.lt.u32.totalorder %s1107_s11, %s1374_s4 }
  0x39   :  { %p1113_p12 = pnand %p1111_p11, %p1108_p10 }
  0x3b   :  { %1116 = shalt.err (!%p1113_p12)
}
  0x3c   :  { %s1117_s16 = scalar_lea.vmem %s1233_s23, 1024  ;;  %p1122_p0 = scmp.lt.s32.totalorder %s1233_s23, %s1233_s23 }
  0x3d   :  { %p1118_p13 = scmp.ne.s32.totalorder %s1233_s23, %s1117_s16  ;;  %p1123_p1 = scmp.lt.s32.totalorder %s1117_s16, %s1117_s16 }
  0x3f   :  { %p1124_p2 = por %p1123_p1, %p1122_p0 }
  0x41   :  { %p1125_p3 = pnand %p1124_p2, %p1118_p13 }
  0x43   :  { %1128 = shalt.err (!%p1125_p3)
}
  0x44   :  { %63 = dma.hbm_to_vmem [thread:$0]  %s1374_s4, 1024, %s1233_s23, [#allocation9], %s1163_s1, %s1163_s1, %s1164_s17  }
  0x45   :  { %1151 = dma.done.wait [#allocation3], 256  }
  0x46   :  { %1152 = vsyncadd [#allocation3], 4294967040 }
  0x47   :  { %1153 = dma.done.wait [#allocation6], 3072  }
  0x48   :  { %1154 = vsyncadd [#allocation6], 4294964224 }
  0x49   :  { %1155 = dma.done.wait [#allocation9], 1024  }
  0x4a   :  { %1156 = vsyncadd [#allocation9], 4294966272  ;;  %v1167_v0 = vmov 0.0   ;;  %v79_v1 = vld [vmem:[#allocation5 + $0x8] sm:$0xff]  ;;  %v81_v2 = vld [vmem:[#allocation5 + $0x18] sm:$0xff]  ;;  %vm94_vm0 = vcmask 523264  }
  0x4b   :  { %165 = vmatprep.mubr.f32.mxu0 %v1167_v0  ;;  %v78_v3 = vld [vmem:[#allocation5] sm:$0xff]  ;;  %v886_v4 = vpack.c.bf16 %v81_v2, %v79_v1  ;;  %v80_v5 = vld [vmem:[#allocation5 + $0x10] sm:$0xff]  ;;  %v83_v6 = vld [vmem:[#allocation5 + $0x28] sm:$0xff]  ;;  %vm236_vm1 = vcmask 130048   ;;  %s1168_s4 = smov 96   ;;  %s1169_s19 = smov 112  }
  0x4c   :  { %v85_v7 = vld [vmem:[#allocation5 + $0x38] sm:$0xff]  ;;  %v888_v8 = vpack.c.bf16 %v80_v5, %v78_v3  ;;  %v82_v10 = vld [vmem:[#allocation5 + $0x20] sm:$0xff]  ;;  %v84_v11 = vld [vmem:[#allocation5 + $0x30] sm:$0xff]  ;;  %s1170_s20 = smov 80   ;;  %s1171_s21 = smov 64   ;;  %vm617_vm3 = vcmask 261120  }
  0x4d   :  { %v890_v9 = vpack.c.bf16 %v85_v7, %v83_v6  ;;  %v87_v12 = vld [vmem:[#allocation5 + $0x48] sm:$0xff]  ;;  %887 = vmatprep.subr.bf16.mxu0 %v886_v4  ;;  %v89_v13 = vld [vmem:[#allocation5 + $0x58] sm:$0xff]  ;;  %v892_v14 = vpack.c.bf16 %v84_v11, %v82_v10  ;;  %v86_v16 = vld [vmem:[#allocation5 + $0x40] sm:$0xff]  ;;  %s1172_s22 = smov 32   ;;  %s1173_s23 = smov 48   ;;  %vm620_vm4 = vcmask 392192  }
  0x4e   :  { %889 = vmatpush1.bf16.msra.mxu0 %v888_v8  ;;  %v894_v15 = vpack.c.bf16 %v89_v13, %v87_v12  ;;  %v88_v17 = vld [vmem:[#allocation5 + $0x50] sm:$0xff]  ;;  %v91_v18 = vld [vmem:[#allocation5 + $0x68] sm:$0xff]  ;;  %v93_v19 = vld [vmem:[#allocation5 + $0x78] sm:$0xff]  ;;  %s1174_s25 = smov [#allocation10]  }
  0x4f   :  { %891 = vmatprep.subr.bf16.mxu0 %v890_v9  ;;  %v896_v20 = vpack.c.bf16 %v88_v17, %v86_v16  ;;  %v898_v21 = vpack.c.bf16 %v93_v19, %v91_v18  ;;  %v90_v22 = vld [vmem:[#allocation5 + $0x60] sm:$0xff]  ;;  %v92_v23 = vld [vmem:[#allocation5 + $0x70] sm:$0xff]  ;;  %v77_v26 = vld [vmem:[#allocation2 + $0x8] sm:$0xff]  ;;  %s726_s26 = sshll.u32 %s1174_s25, 4  ;;  %s727_s26 = int_to_ptr.vmem [resolvable:$true] %s726_s26 }
  0x50   :  { %v900_v24 = vpack.c.bf16 %v92_v23, %v90_v22  ;;  %v76_v25 = vld [vmem:[#allocation2] sm:$0xff]  ;;  %vm1283_vm2 = vmpackc.low %vm236_vm1, %vm236_vm1  ;;  %v212_v1 = vld [vmem:[#allocation8] sm:$0xff]  ;;  %s1129_s27 = scalar_lea.vmem %s727_s26, 256  ;;  %p1134_p5 = scmp.lt.s32.totalorder %s727_s26, %s727_s26 }
  0x51   :  { %v215_v6 = vld [vmem:[#allocation8 + $0x18] sm:$0xff]  ;;  %v214_v12 = vld [vmem:[#allocation8 + $0x10] sm:$0xff]  ;;  %v216_v13 = vld [vmem:[#allocation8 + $0x20] sm:$0xff]  ;;  %p1130_p4 = scmp.ne.s32.totalorder %s727_s26, %s1129_s27  ;;  %p1135_p6 = scmp.lt.s32.totalorder %s1129_s27, %s1129_s27 }
  0x52   :  { %893 = vmatpush1.bf16.msra.mxu0 %v892_v14  ;;  %v217_v17 = vld [vmem:[#allocation8 + $0x28] sm:$0xff] }
  0x53   :  { %895 = vmatprep.subr.bf16.mxu0 %v894_v15  ;;  %p1136_p7 = por %p1135_p6, %p1134_p5 }
  0x55   :  { %p1137_p8 = pnand %p1136_p7, %p1130_p4 }
  0x56   :  { %897 = vmatpush1.bf16.msra.mxu0 %v896_v20  ;;  %v218_v20 = vld [vmem:[#allocation8 + $0x30] sm:$0xff] }
  0x57   :  { %899 = vmatprep.subr.bf16.mxu0 %v898_v21 }
  0x5a   :  { %901 = vmatpush1.bf16.msra.mxu0 %v900_v24 }
  0x5d   :  { %740 = vmatmul.mubr.msk.f32.vlgmr.msra.gmra.mrb[0].mxu0 %vm94_vm0, %v76_v25  ;;  %v219_v25 = vld [vmem:[#allocation8 + $0x38] sm:$0xff] }
  0x5e   :  { %171 = vmatprep.mubr.f32.mxu0 %v1167_v0  ;;  %v213_v0 = vld [vmem:[#allocation8 + $0x8] sm:$0xff] }
  0x61   :  { %741 = vmatmul.mubr.msk.f32.gmra.mrb[2].mxu0 %vm94_vm0, %v77_v26 }
 0x130   :  { %v167_v27 = vpop.f32.mrb[0].mxu0 }
 0x131   :  { %184 = vrot.lane.b32.xlu1 %v167_v27, %s1168_s4  ;;  %180 = vrot.lane.b32.xlu0 %v167_v27, %s1169_s19  ;;  %v169_v28 = vpop.f32.mrb[1].mxu0 }
 0x132   :  { %827 = vmatprep.mubr.msk.f32.mxu1 %vm236_vm1, %v167_v27 }
 0x134   :  { %v173_v29 = vpop.f32.mrb[2].mxu0 }
 0x135   :  { %186 = vrot.lane.b32.xlu1 %v173_v29, %s1168_s4  ;;  %182 = vrot.lane.b32.xlu0 %v173_v29, %s1169_s19  ;;  %v175_v30 = vpop.f32.mrb[3].mxu0  ;;  %v974_v31 = vpack.i.bf16 %v173_v29, %v167_v27 }
 0x136   :  { %v926_v32 = vpack.c.bf16 %v175_v30, %v169_v28  ;;  %v1277_v33 = vpack.i.bf16 %v175_v30, %v169_v28 }
 0x138   :  { %927 = vmatprep.subr.bf16.mxu0 %v926_v32 }
 0x139   :  { %190 = vrot.lane.b32.xlu1 %v173_v29, %s1170_s20  ;;  %188 = vrot.lane.b32.xlu0 %v167_v27, %s1170_s20 }
 0x13a   :  { %929 = vmatpush3.bf16.msra.mxu0 %v926_v32 }
 0x13d   :  { %975 = vrot.lane.b32.xlu0 %v974_v31, %s1171_s21 }
 0x1a3   :  { %v185_v34 = vpop.permute.xlu1 %184  ;;  %v181_v35 = vpop.permute.xlu0 %180 }
 0x1a7   :  { %v187_v36 = vpop.permute.xlu1 %186  ;;  %v183_v37 = vpop.permute.xlu0 %182 }
 0x1a8   :  { %v984_v38 = vpack.i.bf16 %v187_v36, %v185_v34  ;;  %v979_v39 = vpack.i.bf16 %v183_v37, %v181_v35 }
 0x1aa   :  { %985 = vrot.lane.b32.xlu0 %v984_v38, %s1171_s21  ;;  %980 = vrot.lane.b32.xlu1 %v979_v39, %s1171_s21 }
 0x1ab   :  { %v191_v40 = vpop.permute.xlu1 %190  ;;  %v189_v41 = vpop.permute.xlu0 %188 }
 0x1ac   :  { %v989_v42 = vpack.i.bf16 %v191_v40, %v189_v41 }
 0x1ae   :  { %990 = vrot.lane.b32.xlu1 %v989_v42, %s1171_s21 }
 0x1af   :  { %v976_v43 = vpop.permute.xlu0 %975 }
 0x1b0   :  { %v978_v44 = vunpack.i.h.bf16 %v976_v43  ;;  %v977_v45 = vunpack.i.l.bf16 %v976_v43 }
 0x1b2   :  { %995 = vrot.lane.b32.xlu1 %v1277_v33, %s1169_s19  ;;  %v902_v47 = vpack.c.bf16 %v978_v44, %v977_v45 }
 0x1b4   :  { %904 = vmatprep.subr.msk.bf16.mxu1 %vm1283_vm2, %v902_v47 }
 0x1b5   :  { %907 = vmatpush3.bf16.xpose.msk.msra.mxu1 %vm1283_vm2, %v902_v47 }
 0x21c   :  { %v981_v48 = vpop.permute.xlu1 %980  ;;  %v986_v49 = vpop.permute.xlu0 %985 }
 0x21d   :  { %v983_v50 = vunpack.i.h.bf16 %v981_v48  ;;  %v982_v51 = vunpack.i.l.bf16 %v981_v48  ;;  %v988_v52 = vunpack.i.h.bf16 %v986_v49  ;;  %v987_v53 = vunpack.i.l.bf16 %v986_v49 }
 0x21f   :  { %v908_v54 = vpack.c.bf16 %v983_v50, %v982_v51  ;;  %v914_v56 = vpack.c.bf16 %v988_v52, %v987_v53 }
 0x220   :  { %v991_v55 = vpop.permute.xlu1 %990 }
 0x221   :  { %910 = vmatprep.subr.msk.bf16.mxu1 %vm1283_vm2, %v908_v54  ;;  %v993_v58 = vunpack.i.h.bf16 %v991_v55  ;;  %v992_v59 = vunpack.i.l.bf16 %v991_v55 }
 0x222   :  { %913 = vmatpush3.bf16.xpose.msk.msra.mxu1 %vm1283_vm2, %v908_v54 }
 0x223   :  { %916 = vmatprep.subr.msk.bf16.mxu1 %vm1283_vm2, %v914_v56  ;;  %v920_v63 = vpack.c.bf16 %v993_v58, %v992_v59 }
 0x224   :  { %v996_v57 = vpop.permute.xlu1 %995 }
 0x225   :  { %v998_v60 = vunpack.i.h.bf16 %v996_v57  ;;  %v997_v61 = vunpack.i.l.bf16 %v996_v57 }
 0x227   :  { %v930_v62 = vpack.c.bf16 %v998_v60, %v997_v61 }
 0x229   :  { %931 = vmatprep.subr.bf16.mxu0 %v930_v62 }
 0x22a   :  { %919 = vmatpush3.bf16.xpose.msk.msra.mxu1 %vm1283_vm2, %v914_v56  ;;  %933 = vmatpush3.bf16.msra.mxu0 %v930_v62 }
 0x22b   :  { %922 = vmatprep.subr.msk.bf16.mxu1 %vm1283_vm2, %v920_v63 }
 0x232   :  { %925 = vmatpush3.bf16.xpose.msk.msra.mxu1 %vm1283_vm2, %v920_v63 }
 0x239   :  { %828 = vmatmul.mubr.msk.f32.vlgmr.msra.gmra.mrb[0].mxu1 %vm236_vm1, %v173_v29 }
 0x23a   :  { %830 = vmatprep.mubr.msk.f32.mxu1 %vm236_vm1, %v181_v35 }
 0x23d   :  { %831 = vmatmul.mubr.msk.f32.gmra.mrb[2].mxu1 %vm236_vm1, %v183_v37 }
 0x23e   :  { %833 = vmatprep.mubr.msk.f32.mxu1 %vm236_vm1, %v185_v34 }
 0x241   :  { %834 = vmatmul.mubr.msk.f32.gmra.mrb[4].mxu1 %vm236_vm1, %v187_v36 }
 0x242   :  { %836 = vmatprep.mubr.msk.f32.mxu1 %vm236_vm1, %v189_v41 }
 0x245   :  { %837 = vmatmul.mubr.msk.f32.gmra.mrb[6].mxu1 %vm236_vm1, %v191_v40 }
 0x30c   :  { %v829_v2 = vpop.f32.mrb[0].mxu1 }
 0x30d   :  { %v1312_v3 = vadd.f32 %v829_v2, %v213_v0  ;;  %v335_v4 = vpop.f32.mrb[1].mxu1 }
 0x30e   :  { %v336_v5 = vadd.f32 %v335_v4, %v212_v1 }
 0x30f   :  { %v377_v7 = vsel %vm94_vm0, %v1312_v3, -inf }
 0x310   :  { %v832_v8 = vpop.f32.mrb[2].mxu1  ;;  %378 = vmax.xlane.f32.xlu1 %v377_v7  ;;  %v374_v9 = vsel %vm94_vm0, %v336_v5, -inf }
 0x311   :  { %v351_v10 = vadd.f32 %v832_v8, %v215_v6  ;;  %v345_v11 = vpop.f32.mrb[3].mxu1  ;;  %375 = vmax.xlane.f32.xlu0 %v374_v9 }
 0x312   :  { %v346_v15 = vadd.f32 %v345_v11, %v214_v12 }
 0x313   :  { %v383_v14 = vsel %vm94_vm0, %v351_v10, -inf }
 0x314   :  { %v835_v16 = vpop.f32.mrb[4].mxu1  ;;  %v380_v23 = vsel %vm94_vm0, %v346_v15, -inf }
 0x315   :  { %v355_v18 = vpop.f32.mrb[5].mxu1  ;;  %384 = vmax.xlane.f32.xlu0 %v383_v14  ;;  %v361_v21 = vadd.f32 %v835_v16, %v217_v17  ;;  %v623_v16 = vld [vmem:[#allocation7] sm:$0xff]  ;;  %v624_v17 = vld [vmem:[#allocation7 + $0x8] sm:$0xff] }
 0x316   :  { %v356_v19 = vadd.f32 %v355_v18, %v216_v13  ;;  %v625_v18 = vld [vmem:[#allocation7 + $0x10] sm:$0xff] }
 0x317   :  { %v389_v29 = vsel %vm94_vm0, %v361_v21, -inf }
 0x318   :  { %v838_v22 = vpop.f32.mrb[6].mxu1  ;;  %v386_v24 = vsel %vm94_vm0, %v356_v19, -inf }
 0x319   :  { %v365_v26 = vpop.f32.mrb[7].mxu1  ;;  %381 = vmax.xlane.f32.xlu0 %v380_v23  ;;  %387 = vmax.xlane.f32.xlu1 %v386_v24  ;;  %v371_v28 = vadd.f32 %v838_v22, %v219_v25 }
 0x31a   :  { %v366_v27 = vadd.f32 %v365_v26, %v218_v20  ;;  %v626_v20 = vld [vmem:[#allocation7 + $0x18] sm:$0xff]  ;;  %v627_v26 = vld [vmem:[#allocation7 + $0x20] sm:$0xff] }
 0x31b   :  { %v395_v31 = vsel %vm94_vm0, %v371_v28, -inf }
 0x31c   :  { %v392_v30 = vsel %vm94_vm0, %v366_v27, -inf }
 0x31d   :  { %390 = vmax.xlane.f32.xlu0 %v389_v29  ;;  %393 = vmax.xlane.f32.xlu1 %v392_v30  ;;  %v629_v30 = vld [vmem:[#allocation7 + $0x30] sm:$0xff] }
 0x321   :  { %396 = vmax.xlane.f32.xlu0 %v395_v31  ;;  %v630_v31 = vld [vmem:[#allocation7 + $0x38] sm:$0xff] }
 0x32e   :  { %1005 = vrot.lane.b32.xlu1 %v1277_v33, %s1170_s20 }
 0x337   :  { %1000 = vrot.lane.b32.xlu0 %v1277_v33, %s1168_s4 }
 0x39d   :  { %v379_v36 = vpop.xlane.xlu1 %378 }
 0x39e   :  { %v376_v32 = vpop.xlane.xlu0 %375  ;;  %v399_v49 = vsub.f32 %v1312_v3, %v379_v36 }
 0x39f   :  { %v398_v34 = vsub.f32 %v336_v5, %v376_v32 }
 0x3a0   :  { %v408_v56 = vmul.f32 1.442695, %v399_v49 }
 0x3a1   :  { %v406_v35 = vmul.f32 1.442695, %v398_v34 }
 0x3a2   :  { %v385_v37 = vpop.xlane.xlu0 %384 }
 0x3a3   :  { %1009 = vpow2.f32 %v406_v35  ;;  %v401_v38 = vsub.f32 %v351_v10, %v385_v37  ;;  %v954_v35 = vpack.c.bf16 %v630_v31, %v629_v30 }
 0x3a5   :  { %v412_v39 = vmul.f32 1.442695, %v401_v38 }
 0x3a6   :  { %v382_v40 = vpop.xlane.xlu0 %381  ;;  %v388_v41 = vpop.xlane.xlu1 %387 }
 0x3a7   :  { %1011 = vpow2.f32 %v412_v39  ;;  %v400_v42 = vsub.f32 %v346_v15, %v382_v40  ;;  %v402_v43 = vsub.f32 %v356_v19, %v388_v41  ;;  %v942_v19 = vpack.c.bf16 %v624_v17, %v623_v16 }
 0x3a9   :  { %v410_v44 = vmul.f32 1.442695, %v400_v42  ;;  %v414_v45 = vmul.f32 1.442695, %v402_v43 }
 0x3aa   :  { %v391_v46 = vpop.xlane.xlu0 %390  ;;  %v394_v47 = vpop.xlane.xlu1 %393 }
 0x3ab   :  { %1013 = vpow2.f32 %v410_v44  ;;  %v403_v48 = vsub.f32 %v361_v21, %v391_v46  ;;  %v404_v33 = vsub.f32 %v366_v27, %v394_v47  ;;  %v946_v21 = vpack.c.bf16 %v626_v20, %v625_v18  ;;  %v628_v27 = vld [vmem:[#allocation7 + $0x28] sm:$0xff] }
 0x3ac   :  { %1015 = vpow2.f32 %v414_v45 }
 0x3ad   :  { %v1010_v50 = vpop.eup %1009  ;;  %v416_v51 = vmul.f32 1.442695, %v403_v48  ;;  %v418_v52 = vmul.f32 1.442695, %v404_v33 }
 0x3ae   :  { %855 = vmatprep.mubr.msk.f32.mxu0 %vm94_vm0, %v1010_v50  ;;  %v397_v53 = vpop.xlane.xlu0 %396  ;;  %v1006_v55 = vpop.permute.xlu1 %1005  ;;  %v422_v14 = vsel %vm94_vm0, %v1010_v50, 0.0 }
 0x3af   :  { %1017 = vpow2.f32 %v416_v51  ;;  %v405_v54 = vsub.f32 %v371_v28, %v397_v53  ;;  %v1008_v59 = vunpack.i.h.bf16 %v1006_v55  ;;  %v1007_v62 = vunpack.i.l.bf16 %v1006_v55 }
 0x3b0   :  { %1019 = vpow2.f32 %v418_v52  ;;  %v950_v28 = vpack.c.bf16 %v628_v27, %v627_v26 }
 0x3b1   :  { %v1012_v57 = vpop.eup %1011  ;;  %v420_v58 = vmul.f32 1.442695, %v405_v54  ;;  %v938_v5 = vpack.c.bf16 %v1008_v59, %v1007_v62 }
 0x3b2   :  { %v1001_v60 = vpop.permute.xlu0 %1000  ;;  %v431_v61 = vsel %vm94_vm0, %v1012_v57, 0.0 }
 0x3b3   :  { %1021 = vpow2.f32 %v420_v58  ;;  %v1003_v63 = vunpack.i.h.bf16 %v1001_v60  ;;  %v1002_v0 = vunpack.i.l.bf16 %v1001_v60  ;;  %432 = vadd.xlane.f32.xlu0 %v431_v61 }
 0x3b4   :  { %1023 = vpow2.f32 %v408_v56 }
 0x3b5   :  { %v1014_v1 = vpop.eup %1013  ;;  %v934_v2 = vpack.c.bf16 %v1003_v63, %v1002_v0 }
 0x3b6   :  { %v1016_v3 = vpop.eup %1015  ;;  %v428_v4 = vsel %vm94_vm0, %v1014_v1, 0.0 }
 0x3b7   :  { %429 = vadd.xlane.f32.xlu1 %v428_v4  ;;  %v434_v6 = vsel %vm94_vm0, %v1016_v3, 0.0  ;;  %935 = vmatprep.subr.bf16.mxu0 %v934_v2 }
 0x3b8   :  { %435 = vadd.xlane.f32.xlu0 %v434_v6  ;;  %937 = vmatpush3.bf16.msra.mxu0 %v934_v2 }
 0x3b9   :  { %v1018_v7 = vpop.eup %1017  ;;  %939 = vmatprep.subr.bf16.mxu0 %v938_v5 }
 0x3ba   :  { %v1020_v8 = vpop.eup %1019  ;;  %v437_v9 = vsel %vm94_vm0, %v1018_v7, 0.0 }
 0x3bb   :  { %438 = vadd.xlane.f32.xlu1 %v437_v9  ;;  %v440_v10 = vsel %vm94_vm0, %v1020_v8, 0.0 }
 0x3bc   :  { %441 = vadd.xlane.f32.xlu0 %v440_v10  ;;  %941 = vmatpush3.bf16.msra.mxu0 %v938_v5 }
 0x3bd   :  { %v1022_v11 = vpop.eup %1021  ;;  %943 = vmatprep.subr.bf16.mxu0 %v942_v19 }
 0x3be   :  { %v1024_v12 = vpop.eup %1023  ;;  %v443_v13 = vsel %vm94_vm0, %v1022_v11, 0.0 }
 0x3bf   :  { %444 = vadd.xlane.f32.xlu1 %v443_v13  ;;  %856 = vmatmul.mubr.msk.f32.vlgmr.msra.gmra.mrb[4].mxu0 %vm94_vm0, %v1024_v12  ;;  %v425_v15 = vsel %vm94_vm0, %v1024_v12, 0.0 }
 0x3c0   :  { %423 = vadd.xlane.f32.xlu0 %v422_v14  ;;  %858 = vmatprep.mubr.msk.f32.mxu0 %vm94_vm0, %v1014_v1 }
 0x3c1   :  { %945 = vmatpush3.bf16.msra.mxu0 %v942_v19 }
 0x3c2   :  { %947 = vmatprep.subr.bf16.mxu0 %v946_v21 }
 0x3c3   :  { %426 = vadd.xlane.f32.xlu1 %v425_v15  ;;  %859 = vmatmul.mubr.msk.f32.gmra.mrb[6].mxu0 %vm94_vm0, %v1012_v57 }
 0x3c4   :  { %861 = vmatprep.mubr.msk.f32.mxu0 %vm94_vm0, %v1016_v3 }
 0x3c5   :  { %949 = vmatpush3.bf16.msra.mxu0 %v946_v21 }
 0x3c6   :  { %951 = vmatprep.subr.bf16.mxu0 %v950_v28 }
 0x3c7   :  { %862 = vmatmul.mubr.msk.f32.gmra.mrb[8].mxu0 %vm94_vm0, %v1018_v7 }
 0x3c8   :  { %864 = vmatprep.mubr.msk.f32.mxu0 %vm94_vm0, %v1020_v8  ;;  %v766_v8 = vld [vmem:[%s1373_s3] ss:$0 sm:$0xff] }
 0x3c9   :  { %953 = vmatpush3.bf16.msra.mxu0 %v950_v28 }
 0x3ca   :  { %955 = vmatprep.subr.bf16.mxu0 %v954_v35 }
 0x3cb   :  { %865 = vmatmul.mubr.msk.f32.gmra.mrb[10].mxu0 %vm94_vm0, %v1022_v11 }
 0x3cd   :  { %957 = vmatpush3.bf16.msra.mxu0 %v954_v35 }
 0x440   :  { %v433_v23 = vpop.xlane.xlu0 %432 }
 0x441   :  { %1025 = vrcp.f32 %v433_v23 }
 0x444   :  { %v430_v22 = vpop.xlane.xlu1 %429 }
 0x445   :  { %v436_v25 = vpop.xlane.xlu0 %435  ;;  %1027 = vrcp.f32 %v430_v22 }
 0x448   :  { %v439_v24 = vpop.xlane.xlu1 %438 }
 0x449   :  { %1029 = vrcp.f32 %v439_v24  ;;  %v442_v32 = vpop.xlane.xlu0 %441 }
 0x44a   :  { %1031 = vrcp.f32 %v436_v25 }
 0x44b   :  { %v1026_v37 = vpop.eup %1025 }
 0x44c   :  { %v445_v29 = vpop.xlane.xlu1 %444 }
 0x44d   :  { %1033 = vrcp.f32 %v445_v29  ;;  %v424_v54 = vpop.xlane.xlu0 %423 }
 0x44e   :  { %1035 = vrcp.f32 %v442_v32 }
 0x44f   :  { %v1028_v39 = vpop.eup %1027  ;;  %1037 = vrcp.f32 %v424_v54 }
 0x450   :  { %v427_v55 = vpop.xlane.xlu1 %426 }
 0x451   :  { %1039 = vrcp.f32 %v427_v55 }
 0x453   :  { %v1030_v43 = vpop.eup %1029 }
 0x454   :  { %v1032_v45 = vpop.eup %1031 }
 0x457   :  { %v1034_v33 = vpop.eup %1033 }
 0x458   :  { %v1036_v50 = vpop.eup %1035 }
 0x459   :  { %v1038_v58 = vpop.eup %1037 }
 0x45b   :  { %v1040_v59 = vpop.eup %1039 }
 0x492   :  { %v857_v34 = vpop.f32.mrb[4].mxu0 }
 0x493   :  { %v544_v36 = vpop.f32.mrb[5].mxu0  ;;  %v584_v62 = vmul.f32 %v1040_v59, %v857_v34 }
 0x494   :  { %v583_v63 = vmul.f32 %v1038_v58, %v544_v36 }
 0x496   :  { %v860_v38 = vpop.f32.mrb[6].mxu0 }
 0x497   :  { %v586_v40 = vmul.f32 %v1026_v37, %v860_v38  ;;  %v554_v41 = vpop.f32.mrb[7].mxu0 }
 0x498   :  { %v585_v42 = vmul.f32 %v1028_v39, %v554_v41 }
 0x499   :  { %595 = vrot.lane.b32.xlu1 %v586_v40, %s1161_s29 }
 0x49a   :  { %593 = vrot.lane.b32.xlu0 %v585_v42, %s1161_s29  ;;  %v863_v44 = vpop.f32.mrb[8].mxu0 }
 0x49b   :  { %v588_v46 = vmul.f32 %v1030_v43, %v863_v44  ;;  %v564_v47 = vpop.f32.mrb[9].mxu0 }
 0x49c   :  { %v587_v48 = vmul.f32 %v1032_v45, %v564_v47 }
 0x49e   :  { %603 = vrot.lane.b32.xlu0 %v588_v46, %s1172_s22  ;;  %601 = vrot.lane.b32.xlu1 %v587_v48, %s1172_s22  ;;  %v866_v49 = vpop.f32.mrb[10].mxu0 }
 0x49f   :  { %v590_v51 = vmul.f32 %v1034_v33, %v866_v49  ;;  %v574_v52 = vpop.f32.mrb[11].mxu0 }
 0x4a0   :  { %v589_v53 = vmul.f32 %v1036_v50, %v574_v52 }
 0x4a2   :  { %611 = vrot.lane.b32.xlu0 %v590_v51, %s1173_s23  ;;  %609 = vrot.lane.b32.xlu1 %v589_v53, %s1173_s23 }
 0x50b   :  { %v596_v56 = vpop.permute.xlu1 %595 }
 0x50c   :  { %v594_v57 = vpop.permute.xlu0 %593  ;;  %v616_v0 = vsel %vm236_vm1, %v584_v62, %v596_v56 }
 0x50d   :  { %v615_v1 = vsel %vm236_vm1, %v583_v63, %v594_v57 }
 0x510   :  { %v604_v60 = vpop.permute.xlu0 %603  ;;  %v602_v61 = vpop.permute.xlu1 %601 }
 0x511   :  { %v619_v2 = vsel %vm617_vm3, %v616_v0, %v604_v60  ;;  %v618_v3 = vsel %vm617_vm3, %v615_v1, %v602_v61 }
 0x514   :  { %v612_v4 = vpop.permute.xlu0 %611  ;;  %v610_v5 = vpop.permute.xlu1 %609 }
 0x515   :  { %v622_v6 = vsel %vm620_vm4, %v619_v2, %v612_v4  ;;  %v621_v7 = vsel %vm620_vm4, %v618_v3, %v610_v5 }
 0x516   :  { %883 = vmatprep.mubr.msk.f32.mxu0 %vm94_vm0, %v621_v7 }
 0x517   :  { %884 = vmatmul.mubr.msk.f32.vlgmr.msra.gmra.mrb[12].mxu0 %vm94_vm0, %v622_v6 }
 0x5ea   :  { %v885_v9 = vpop.f32.mrb[12].mxu0 }
 0x5eb   :  { %v716_v10 = vadd.f32 %v885_v9, %v766_v8  ;;  %v710_v11 = vpop.f32.mrb[13].mxu0 }
 0x5ec   :  { %v711_v12 = vadd.f32 %v766_v8, %v710_v11 }
 0x5ed   :  { %720 = vst.msk [vmem:[#allocation10 + $0x8] sm:$0xff] %vm94_vm0, %v716_v10 }
 0x5ee   :  { %719 = vst.msk [vmem:[#allocation10] sm:$0xff] %vm94_vm0, %v711_v12 }
 0x5ef   :  { %1140 = shalt.err (!%p1137_p8)
}
 0x5f0   :  { %s1141_s30 = scalar_lea.hbm %s1375_s5, 256 }
 0x5f1   :  { %p1142_p9 = scmp.ne.s32.totalorder %s1375_s5, %s1141_s30  ;;  %p1145_p10 = scmp.lt.u32.totalorder %s1141_s30, %s1375_s5 }
 0x5f3   :  { %p1147_p11 = pnand %p1145_p10, %p1142_p9 }
 0x5f5   :  { %1150 = shalt.err (!%p1147_p11)
}
 0x5f6   :  { %732 = dma.vmem_to_hbm [thread:$0]  %s727_s26, 256, %s1375_s5, [#allocation4], %s1163_s1, %s1163_s1, %s1164_s17  }
 0x5f7   :  { %1157 = dma.done.wait [#allocation4], 256  }
 0x5f8   :  { %1158 = vsyncadd [#allocation4], 4294967040 }
 0x5f9   :  { %736 = vsyncpa [#allocation3], 1 }
 0x5fa   :  { %737 = vsyncpa [#allocation6], 1 }
 0x5fb   :  { %738 = vsyncpa [#allocation9], 1 }
 0x5fc   :  { %739 = vsyncpa [#allocation4], 1 }

</bundles_post_ra>
